<compile_context>
chip_gen: v7x
topology: tpu7x:2x2x1
jax: 0.10.0
libtpu: 0.0.40
codegen_flags: <defaults>
</compile_context>

<pallas_src>
import jax
import jax.numpy as jnp
from jax import lax
from jax.experimental import pallas as pl
from jax.experimental.pallas import tpu as pltpu


def _round_up(n, m):
    return ((n + m - 1) // m) * m


def lstm_seq_kernel(x_ref, h0_ref, c0_ref, wih_ref, whh_ref, b_ref,
                    wdec_ref, bdec_ref, y_ref, hc_ref, xp_ref, hs_ref):
    """Shapes:
       x:(T,H)  h0/c0:(1,H)  wih/whh:(H,4H)  b:(1,4H)
       wdec:(H,OP) zero-padded cols  bdec:(1,OP)
       y:(T,OP)  hc:(2,H) rows = [h_T ; c_T]
       scratch: xp:(T,4H) hoisted input projection, hs:(T,H) per-step h_t."""
    T, H = x_ref.shape

    # ---- Hoisted, MXU-dense input projection (one matmul for all T steps) --
    xp_ref[...] = (jnp.dot(x_ref[...].astype(wih_ref.dtype), wih_ref[...],
                           preferred_element_type=jnp.float32) + b_ref[...])

    # Recurrent weight loaded once; vreg/VMEM-resident across all steps.
    whh = whh_ref[...]

    def step(t, carry):
        h, c = carry
        # Serial chain: one small matmul + 3 EUP passes + a few VPU ops.
        gates = xp_ref[pl.ds(t, 1), :] + jnp.dot(
            h.astype(whh.dtype), whh, preferred_element_type=jnp.float32)
        sg = jax.nn.sigmoid(gates)          # one EUP pass over full (1,4H)
        tg = jnp.tanh(gates)                # one EUP pass over full (1,4H)
        i_g = sg[:, 0 * H:1 * H]
        f_g = sg[:, 1 * H:2 * H]
        o_g = sg[:, 3 * H:4 * H]
        g_g = tg[:, 2 * H:3 * H]
        c_new = f_g * c + i_g * g_g
        h_new = o_g * jnp.tanh(c_new)
        hs_ref[pl.ds(t, 1), :] = h_new      # decoder input; not on recurrence
        return (h_new, c_new)

    unroll = True if T <= 32 else 8
    h_T, c_T = lax.fori_loop(0, T, step, (h0_ref[...], c0_ref[...]),
                             unroll=unroll)

    # ---- Finalize: final state + one MXU-dense decoder matmul for all y_t --
    hc_ref[0:1, :] = h_T
    hc_ref[1:2, :] = c_T
    y_ref[...] = (jnp.dot(hs_ref[...].astype(wdec_ref.dtype), wdec_ref[...],
                          preferred_element_type=jnp.float32) + bdec_ref[...])


def lstm1_sequence(xs, h, params):
    """Run T LSTM_1 steps in ONE pallas_call (weights stay VMEM-resident).

    xs: (T, H) inputs (input_size == hidden_size for this module).
    h : (h0, c0), each reshapeable to (1, H).
    Returns (ys (T, O), (h_n (1,1,H), c_n (1,1,H))).
    """
    H = params["hidden_size"]
    O = params["output_size"]
    OP = params["w_dec_p"].shape[1]                 # 128-lane padded decoder out
    xs2 = jnp.reshape(xs, (-1, H)).astype(jnp.float32)
    T = xs2.shape[0]

    h0 = jnp.reshape(h[0], (1, H)).astype(jnp.float32)
    c0 = jnp.reshape(h[1], (1, H)).astype(jnp.float32)

    vmem = pl.BlockSpec(memory_space=pltpu.MemorySpace.VMEM)
    y_pad, hc = pl.pallas_call(
        lstm_seq_kernel,
        out_shape=(jax.ShapeDtypeStruct((T, OP), jnp.float32),
                   jax.ShapeDtypeStruct((2, H), jnp.float32)),
        in_specs=[vmem] * 8,
        out_specs=(vmem, vmem),
        scratch_shapes=[pltpu.VMEM((T, 4 * H), jnp.float32),   # x @ W_ih^T + b
                        pltpu.VMEM((T, H), jnp.float32)],      # all h_t
        compiler_params=pltpu.CompilerParams(
            vmem_limit_bytes=32 * 1024 * 1024),
        # TODO(synk): grid-over-T chunking for long sequences (see header).
    )(xs2, h0, c0,
      params["w_ih_t"], params["w_hh_t"], params["b_gates"],
      params["w_dec_p"], params["b_dec_p"])

    ys = y_pad[:, :O]
    h_n = hc[0:1, :].reshape(1, 1, H)
    c_n = hc[1:2, :].reshape(1, 1, H)
    return ys, (h_n, c_n)


def lstm1_forward(x, h, params):
    """Exact PyTorch LSTM_1.forward: one step -> (output (1,O), (h_n, c_n))."""
    H = params["hidden_size"]
    ys, hc = lstm1_sequence(jnp.reshape(x, (1, H)), h, params)
    return ys, hc


def init_params(key, hidden_size, output_size, weights_dtype=jnp.float32):
    """PyTorch-style uniform(-1/sqrt(H), 1/sqrt(H)) init.

    weights_dtype=jnp.bfloat16 is recommended on v6e/v7x for larger H (halves
    weight HBM/VMEM traffic); biases and all elementwise math stay f32
    (v5e guidance: keep f32 weights, the default here).
    """
    H, O = hidden_size, output_size
    OP = _round_up(O, 128)
    k = 1.0 / jnp.sqrt(jnp.float32(H))
    ks = jax.random.split(key, 6)
    w_ih = jax.random.uniform(ks[0], (4 * H, H), jnp.float32, -k, k)
    w_hh = jax.random.uniform(ks[1], (4 * H, H), jnp.float32, -k, k)
    b_ih = jax.random.uniform(ks[2], (4 * H,), jnp.float32, -k, k)
    b_hh = jax.random.uniform(ks[3], (4 * H,), jnp.float32, -k, k)
    w_dec = jax.random.uniform(ks[4], (O, H), jnp.float32, -k, k)
    b_dec = jax.random.uniform(ks[5], (O,), jnp.float32, -k, k)
    # Decoder weight/bias zero-padded to a 128-lane multiple -> lane-dense
    # unmasked store of y inside the kernel; wrapper slices back to O.
    w_dec_p = jnp.zeros((H, OP), jnp.float32).at[:, :O].set(w_dec.T)
    b_dec_p = jnp.zeros((1, OP), jnp.float32).at[:, :O].set(b_dec)
    return {
        "hidden_size": H,
        "output_size": O,
        "w_ih_t": w_ih.T.astype(weights_dtype),        # (H, 4H)
        "w_hh_t": w_hh.T.astype(weights_dtype),        # (H, 4H)
        "b_gates": (b_ih + b_hh).reshape(1, 4 * H),    # f32
        "w_dec_p": w_dec_p.astype(weights_dtype),      # (H, OP)
        "b_dec_p": b_dec_p,                            # (1, OP) f32
        # f32 copies kept only for the pure-JAX reference.
        "w_ih_t_f32": w_ih.T,
        "w_hh_t_f32": w_hh.T,
        "w_dec_t_f32": w_dec.T,
        "b_dec_f32": b_dec.reshape(1, O),
    }


def reference_step(x, h, c, params):
    """Pure-JAX single-step reference of the PyTorch semantics (f32 weights)."""
    H = params["hidden_size"]
    x2 = jnp.reshape(x, (1, H))
    gates = (x2 @ params["w_ih_t_f32"] + h @ params["w_hh_t_f32"]
             + params["b_gates"])
    i = jax.nn.sigmoid(gates[:, 0:H])
    f = jax.nn.sigmoid(gates[:, H:2 * H])
    g = jnp.tanh(gates[:, 2 * H:3 * H])
    o = jax.nn.sigmoid(gates[:, 3 * H:4 * H])
    c_new = f * c + i * g
    h_new = o * jnp.tanh(c_new)
    y = h_new @ params["w_dec_t_f32"] + params["b_dec_f32"]
    return y, h_new, c_new


if __name__ == "__main__":
    HIDDEN = 32
    OUTPUT = 64
    SEQ = 8

    key = jax.random.PRNGKey(0)
    k_param, k_x = jax.random.split(key)

    params = init_params(k_param, HIDDEN, OUTPUT)                 # f32 weights
    h0c0 = (jnp.zeros((1, 1, HIDDEN), jnp.float32),               # init_hidden()
            jnp.zeros((1, 1, HIDDEN), jnp.float32))

    # --- 1) Exact PyTorch forward semantics: one step -----------------------
    x = jax.random.normal(k_x, (HIDDEN,), jnp.float32)            # one embedded token
    y, (h_n, c_n) = lstm1_forward(x, h0c0, params)
    jax.block_until_ready((y, h_n, c_n))

    y_ref, h_ref, c_ref = reference_step(
        x, h0c0[0].reshape(1, HIDDEN), h0c0[1].reshape(1, HIDDEN), params)
    assert y.shape == (1, OUTPUT)
    assert h_n.shape == (1, 1, HIDDEN) and c_n.shape == (1, 1, HIDDEN)
    assert jnp.allclose(y, y_ref, atol=1e-5)
    assert jnp.allclose(h_n.reshape(1, HIDDEN), h_ref, atol=1e-5)
    assert jnp.allclose(c_n.reshape(1, HIDDEN), c_ref, atol=1e-5)

    # --- 2) T-step generation in ONE pallas_call (launch + weight DMA amortized)
    xs = jax.random.normal(jax.random.PRNGKey(1), (SEQ, HIDDEN), jnp.float32)
    ys, (h_T, c_T) = lstm1_sequence(xs, h0c0, params)
    jax.block_until_ready((ys, h_T, c_T))

    h_r = h0c0[0].reshape(1, HIDDEN)
    c_r = h0c0[1].reshape(1, HIDDEN)
    ys_ref = []
    for t in range(SEQ):
        y_r, h_r, c_r = reference_step(xs[t], h_r, c_r, params)
        ys_ref.append(y_r)
    ys_ref = jnp.concatenate(ys_ref, axis=0)
    assert ys.shape == (SEQ, OUTPUT)
    assert jnp.allclose(ys, ys_ref, atol=1e-4)
    assert jnp.allclose(h_T.reshape(1, HIDDEN), h_r, atol=1e-4)
    assert jnp.allclose(c_T.reshape(1, HIDDEN), c_r, atol=1e-4)

    # --- 3) bf16-weight variant (v6e/v7x option); elementwise math stays f32
    params_bf16 = init_params(k_param, HIDDEN, OUTPUT,
                              weights_dtype=jnp.bfloat16)
    y16, (h16, c16) = lstm1_forward(x, h0c0, params_bf16)
    jax.block_until_ready((y16, h16, c16))
    assert jnp.allclose(y16, y_ref, atol=1e-1)   # loose: bf16 weight rounding

    print("KERNEL_OK")
</pallas_src>

<mosaic_0001>
module attributes {stable_mosaic.version = 11 : i64} {
  func.func @lstm_seq_kernel(%arg0: memref<1x32xf32, #tpu.memory_space<vmem>>, %arg1: memref<1x32xf32, #tpu.memory_space<vmem>>, %arg2: memref<1x32xf32, #tpu.memory_space<vmem>>, %arg3: memref<32x128xf32, #tpu.memory_space<vmem>>, %arg4: memref<32x128xf32, #tpu.memory_space<vmem>>, %arg5: memref<1x128xf32, #tpu.memory_space<vmem>>, %arg6: memref<32x128xf32, #tpu.memory_space<vmem>>, %arg7: memref<1x128xf32, #tpu.memory_space<vmem>>, %arg8: memref<1x128xf32, #tpu.memory_space<vmem>>, %arg9: memref<2x32xf32, #tpu.memory_space<vmem>>, %arg10: memref<1x128xf32, #tpu.memory_space<vmem>>, %arg11: memref<1x32xf32, #tpu.memory_space<vmem>>) attributes {dimension_semantics = [], scalar_prefetch = 0 : i64, scratch_operands = 2 : i64, tpu.core_type = #tpu.core_type<tc>} {
    %c0 = arith.constant 0 : index
    %c0_0 = arith.constant 0 : index
    %0 = vector.load %arg0[%c0, %c0_0] : memref<1x32xf32, #tpu.memory_space<vmem>>, vector<1x32xf32>
    %c0_1 = arith.constant 0 : index
    %c0_2 = arith.constant 0 : index
    %1 = vector.load %arg3[%c0_1, %c0_2] : memref<32x128xf32, #tpu.memory_space<vmem>>, vector<32x128xf32>
    %cst = arith.constant dense<0.000000e+00> : vector<1x128xf32>
    %2 = tpu.matmul %0, %1, %cst {dimension_numbers = #tpu.dot_dimension_numbers<[1], [0], [0], [1], [0, 0, 1, 1], [], []>} : vector<1x32xf32>, vector<32x128xf32>, vector<1x128xf32> -> vector<1x128xf32>
    %c0_3 = arith.constant 0 : index
    %c0_4 = arith.constant 0 : index
    %3 = vector.load %arg5[%c0_3, %c0_4] : memref<1x128xf32, #tpu.memory_space<vmem>>, vector<1x128xf32>
    %4 = arith.addf %2, %3 : vector<1x128xf32>
    %c0_5 = arith.constant 0 : index
    %c0_6 = arith.constant 0 : index
    %5 = vector.load %arg10[%c0_5, %c0_6] : memref<1x128xf32, #tpu.memory_space<vmem>>, vector<1x128xf32>
    tpu.vector_store %arg10[%c0_5, %c0_6], %4 {strides = array<i32>} : memref<1x128xf32, #tpu.memory_space<vmem>>, vector<1x128xf32>,
    %c0_7 = arith.constant 0 : index
    %c0_8 = arith.constant 0 : index
    %6 = vector.load %arg4[%c0_7, %c0_8] : memref<32x128xf32, #tpu.memory_space<vmem>>, vector<32x128xf32>
    %c0_9 = arith.constant 0 : index
    %c0_10 = arith.constant 0 : index
    %7 = vector.load %arg1[%c0_9, %c0_10] : memref<1x32xf32, #tpu.memory_space<vmem>>, vector<1x32xf32>
    %c0_11 = arith.constant 0 : index
    %c0_12 = arith.constant 0 : index
    %8 = vector.load %arg2[%c0_11, %c0_12] : memref<1x32xf32, #tpu.memory_space<vmem>>, vector<1x32xf32>
    %c0_i32 = arith.constant 0 : i32
    %9 = arith.index_cast %c0_i32 : i32 to index
    %c0_13 = arith.constant 0 : index
    %10 = vector.load %arg10[%9, %c0_13] : memref<1x128xf32, #tpu.memory_space<vmem>>, vector<1x128xf32>
    %cst_14 = arith.constant dense<0.000000e+00> : vector<1x128xf32>
    %11 = tpu.matmul %7, %6, %cst_14 {dimension_numbers = #tpu.dot_dimension_numbers<[1], [0], [0], [1], [0, 0, 1, 1], [], []>} : vector<1x32xf32>, vector<32x128xf32>, vector<1x128xf32> -> vector<1x128xf32>
    %12 = arith.addf %10, %11 : vector<1x128xf32>
    %13 = arith.negf %12 : vector<1x128xf32>
    %14 = math.exp %13 : vector<1x128xf32>
    %cst_15 = arith.constant 1.000000e+00 : f32
    %15 = vector.broadcast %cst_15 : f32 to vector<1x128xf32>
    %16 = arith.addf %15, %14 : vector<1x128xf32>
    %17 = arith.divf %15, %16 : vector<1x128xf32>
    %18 = math.tanh %12 : vector<1x128xf32>
    %19 = vector.extract_strided_slice %17 {offsets = [0, 0], sizes = [1, 32], strides = [1, 1]} : vector<1x128xf32> to vector<1x32xf32>
    %20 = vector.extract_strided_slice %17 {offsets = [0, 32], sizes = [1, 32], strides = [1, 1]} : vector<1x128xf32> to vector<1x32xf32>
    %21 = vector.extract_strided_slice %17 {offsets = [0, 96], sizes = [1, 32], strides = [1, 1]} : vector<1x128xf32> to vector<1x32xf32>
    %22 = vector.extract_strided_slice %18 {offsets = [0, 64], sizes = [1, 32], strides = [1, 1]} : vector<1x128xf32> to vector<1x32xf32>
    %23 = arith.mulf %20, %8 : vector<1x32xf32>
    %24 = arith.mulf %19, %22 : vector<1x32xf32>
    %25 = arith.addf %23, %24 : vector<1x32xf32>
    %26 = math.tanh %25 : vector<1x32xf32>
    %27 = arith.mulf %21, %26 : vector<1x32xf32>
    %28 = arith.index_cast %c0_i32 : i32 to index
    %c0_16 = arith.constant 0 : index
    %29 = vector.load %arg11[%28, %c0_16] : memref<1x32xf32, #tpu.memory_space<vmem>>, vector<1x32xf32>
    tpu.vector_store %arg11[%28, %c0_16], %27 {strides = array<i32>} : memref<1x32xf32, #tpu.memory_space<vmem>>, vector<1x32xf32>,
    %c1_i32 = arith.constant 1 : i32
    %c0_17 = arith.constant 0 : index
    %c0_18 = arith.constant 0 : index
    %30 = vector.load %arg9[%c0_17, %c0_18] : memref<2x32xf32, #tpu.memory_space<vmem>>, vector<1x32xf32>
    tpu.vector_store %arg9[%c0_17, %c0_18], %27 {strides = array<i32>} : memref<2x32xf32, #tpu.memory_space<vmem>>, vector<1x32xf32>,
    %c1 = arith.constant 1 : index
    %c0_19 = arith.constant 0 : index
    %31 = vector.load %arg9[%c1, %c0_19] : memref<2x32xf32, #tpu.memory_space<vmem>>, vector<1x32xf32>
    tpu.vector_store %arg9[%c1, %c0_19], %25 {strides = array<i32>} : memref<2x32xf32, #tpu.memory_space<vmem>>, vector<1x32xf32>,
    %c0_20 = arith.constant 0 : index
    %c0_21 = arith.constant 0 : index
    %32 = vector.load %arg11[%c0_20, %c0_21] : memref<1x32xf32, #tpu.memory_space<vmem>>, vector<1x32xf32>
    %c0_22 = arith.constant 0 : index
    %c0_23 = arith.constant 0 : index
    %33 = vector.load %arg6[%c0_22, %c0_23] : memref<32x128xf32, #tpu.memory_space<vmem>>, vector<32x128xf32>
    %cst_24 = arith.constant dense<0.000000e+00> : vector<1x128xf32>
    %34 = tpu.matmul %32, %33, %cst_24 {dimension_numbers = #tpu.dot_dimension_numbers<[1], [0], [0], [1], [0, 0, 1, 1], [], []>} : vector<1x32xf32>, vector<32x128xf32>, vector<1x128xf32> -> vector<1x128xf32>
    %c0_25 = arith.constant 0 : index
    %c0_26 = arith.constant 0 : index
    %35 = vector.load %arg7[%c0_25, %c0_26] : memref<1x128xf32, #tpu.memory_space<vmem>>, vector<1x128xf32>
    %36 = arith.addf %34, %35 : vector<1x128xf32>
    %c0_27 = arith.constant 0 : index
    %c0_28 = arith.constant 0 : index
    %37 = vector.load %arg8[%c0_27, %c0_28] : memref<1x128xf32, #tpu.memory_space<vmem>>, vector<1x128xf32>
    tpu.vector_store %arg8[%c0_27, %c0_28], %36 {strides = array<i32>} : memref<1x128xf32, #tpu.memory_space<vmem>>, vector<1x128xf32>,
    return
  }
}

</mosaic_0001>

<bundles_post_ra>
// kernel: tpu_custom_call.1
= control target key start
LH: loop header
LB: loop body
LE: loop exit
PB: predicated region body
PF: predicated region fallthrough
CT: control target
= control target key end

     0   :  { %15 = vsyncpa [#allocation5], 0  ;;  %s813_s0 = inlined_call_operand.hbm [shape: f32[1,32], index: 0, kind: input, shape index: {}]   ;;  %s814_s1 = inlined_call_operand.vmem [shape: f32[1,32], index: 1, kind: input, shape index: {}]   ;;  %s815_s2 = inlined_call_operand.vmem [shape: f32[1,32], index: 2, kind: input, shape index: {}]   ;;  %s816_s3 = inlined_call_operand.hbm [shape: f32[32,128], index: 3, kind: input, shape index: {}]   ;;  %s817_s4 = inlined_call_operand.hbm [shape: f32[32,128], index: 4, kind: input, shape index: {}]   ;;  %s818_s5 = inlined_call_operand.vmem [shape: f32[1,128], index: 5, kind: input, shape index: {}]   ;;  %s819_s6 = inlined_call_operand.hbm [shape: f32[32,128], index: 6, kind: input, shape index: {}]   ;;  %s820_s7 = inlined_call_operand.vmem [shape: f32[1,128], index: 7, kind: input, shape index: {}]   ;;  %s821_s8 = inlined_call_operand.hbm [shape: f32[1,128], index: 8, kind: output, shape index: {0}]   ;;  %s822_s9 = inlined_call_operand.hbm [shape: f32[2,32], index: 9, kind: output, shape index: {1}]  }
   0x1   :  { %16 = vsyncpa [#allocation8], 0 }
   0x2   :  { %17 = vsyncpa [#allocation11], 0 }
   0x3   :  { %18 = vsyncpa [#allocation6], 0 }
   0x4   :  { %19 = vsyncpa [#allocation14], 0  ;;  %s641_s30 = smov [#allocation7]   ;;  %s499_s13 = scalar_lea.hbm %s816_s3, 512 }
   0x5   :  { %s39_s10 = sshll.u32 %s641_s30, 4  ;;  %p500_p0 = scmp.ne.s32.totalorder %s816_s3, %s499_s13  ;;  %s40_s10 = int_to_ptr.vmem [resolvable:$true] %s39_s10 }
   0x6   :  { %p503_p1 = scmp.lt.u32.totalorder %s499_s13, %s816_s3 }
   0x8   :  { %p505_p2 = pnand %p503_p1, %p500_p0 }
   0xa   :  { %508 = shalt.err (!%p505_p2)
}
   0xb   :  { %s509_s18 = scalar_lea.vmem %s40_s10, 512  ;;  %p514_p4 = scmp.lt.s32.totalorder %s40_s10, %s40_s10 }
   0xc   :  { %p510_p3 = scmp.ne.s32.totalorder %s40_s10, %s509_s18  ;;  %p515_p5 = scmp.lt.s32.totalorder %s509_s18, %s509_s18 }
   0xe   :  { %p516_p6 = por %p515_p5, %p514_p4 }
  0x10   :  { %p517_p7 = pnand %p516_p6, %p510_p3 }
  0x12   :  { %520 = shalt.err (!%p517_p7)
}
  0x13   :  { %s642_s19 = smov 128   ;;  %s643_s20 = smov 8  }
  0x14   :  { %45 = dma.hbm_to_vmem [thread:$0]  %s816_s3, 512, %s40_s10, [#allocation8], %s642_s19, %s642_s19, %s643_s20  }
  0x15   :  { %s644_s23 = smov [#allocation4]   ;;  %s645_s25 = smov [#allocation9]  }
  0x16   :  { %s26_s24 = sshll.u32 %s644_s23, 4  ;;  %s51_s26 = sshll.u32 %s645_s25, 4  ;;  %s27_s24 = int_to_ptr.vmem [resolvable:$true] %s26_s24  ;;  %s52_s26 = int_to_ptr.vmem [resolvable:$true] %s51_s26 }
  0x17   :  { %s521_s29 = scalar_lea.hbm %s813_s0, 16 }
  0x18   :  { %p522_p8 = scmp.ne.s32.totalorder %s813_s0, %s521_s29  ;;  %p525_p9 = scmp.lt.u32.totalorder %s521_s29, %s813_s0 }
  0x1a   :  { %p527_p10 = pnand %p525_p9, %p522_p8 }
  0x1c   :  { %530 = shalt.err (!%p527_p10)
}
  0x1d   :  { %s531_s3 = scalar_lea.vmem %s27_s24, 16  ;;  %s535_s10 = scalar_lea.vmem %s27_s24, 32 }
  0x1e   :  { %p532_p11 = scmp.ne.s32.totalorder %s27_s24, %s531_s3  ;;  %p536_p12 = scmp.lt.s32.totalorder %s27_s24, %s27_s24 }
  0x1f   :  { %p537_p13 = scmp.lt.s32.totalorder %s535_s10, %s531_s3 }
  0x21   :  { %p538_p0 = por %p537_p13, %p536_p12 }
  0x23   :  { %p539_p1 = pnand %p538_p0, %p532_p11 }
  0x25   :  { %542 = shalt.err (!%p539_p1)
}
  0x26   :  { %29 = dma.hbm_to_vmem [thread:$0]  %s813_s0, 16, %s27_s24, [#allocation5]  }
  0x27   :  { %s543_s18 = scalar_lea.hbm %s817_s4, 512 }
  0x28   :  { %p544_p2 = scmp.ne.s32.totalorder %s817_s4, %s543_s18  ;;  %p547_p3 = scmp.lt.u32.totalorder %s543_s18, %s817_s4 }
  0x2a   :  { %p549_p4 = pnand %p547_p3, %p544_p2 }
  0x2c   :  { %552 = shalt.err (!%p549_p4)
}
  0x2d   :  { %s553_s27 = scalar_lea.vmem %s52_s26, 512  ;;  %p558_p6 = scmp.lt.s32.totalorder %s52_s26, %s52_s26 }
  0x2e   :  { %p554_p5 = scmp.ne.s32.totalorder %s52_s26, %s553_s27  ;;  %p559_p7 = scmp.lt.s32.totalorder %s553_s27, %s553_s27 }
  0x30   :  { %p560_p8 = por %p559_p7, %p558_p6 }
  0x32   :  { %p561_p9 = pnand %p560_p8, %p554_p5 }
  0x34   :  { %564 = shalt.err (!%p561_p9)
}
  0x35   :  { %57 = dma.hbm_to_vmem [thread:$0]  %s817_s4, 512, %s52_s26, [#allocation8], %s642_s19, %s642_s19, %s643_s20  }
  0x36   :  { %s646_s28 = smov [#allocation10]   ;;  %s565_s12 = scalar_lea.hbm %s819_s6, 512 }
  0x37   :  { %s65_s29 = sshll.u32 %s646_s28, 4  ;;  %p566_p10 = scmp.ne.s32.totalorder %s819_s6, %s565_s12  ;;  %s66_s29 = int_to_ptr.vmem [resolvable:$true] %s65_s29 }
  0x38   :  { %p569_p11 = scmp.lt.u32.totalorder %s565_s12, %s819_s6 }
  0x3a   :  { %p571_p12 = pnand %p569_p11, %p566_p10 }
  0x3c   :  { %574 = shalt.err (!%p571_p12)
}
  0x3d   :  { %s575_s15 = scalar_lea.vmem %s66_s29, 512  ;;  %p580_p0 = scmp.lt.s32.totalorder %s66_s29, %s66_s29 }
  0x3e   :  { %p576_p13 = scmp.ne.s32.totalorder %s66_s29, %s575_s15  ;;  %p581_p1 = scmp.lt.s32.totalorder %s575_s15, %s575_s15 }
  0x40   :  { %p582_p2 = por %p581_p1, %p580_p0 }
  0x42   :  { %p583_p3 = pnand %p582_p2, %p576_p13 }
  0x44   :  { %586 = shalt.err (!%p583_p3)
}
  0x45   :  { %71 = dma.hbm_to_vmem [thread:$0]  %s819_s6, 512, %s66_s29, [#allocation11], %s642_s19, %s642_s19, %s643_s20  }
  0x46   :  { %631 = dma.done.wait [#allocation5], 16  }
  0x47   :  { %632 = vsyncadd [#allocation5], 4294967280 }
  0x48   :  { %633 = dma.done.wait [#allocation8], 1024  }
  0x49   :  { %634 = vsyncadd [#allocation8], 4294966272 }
  0x4a   :  { %635 = dma.done.wait [#allocation11], 512  }
  0x4b   :  { %636 = vsyncadd [#allocation11], 4294966784  ;;  %v647_v0 = vmov 0.0|0.0   ;;  %vm648_vm0 = vmmov 0   ;;  %v649_v1 = vmov 0.0   ;;  %v87_v2 = vld [vmem:[#allocation7] sm:$0xff]  ;;  %v277_v36 = vlaneseq }
  0x4c   :  { %459 = vmatprep.subr.bf16.mxu0 %v647_v0  ;;  %434 = vmatprep.mubr.msk.f32.mxu0 %vm648_vm0, %v649_v1  ;;  %v88_v3 = vld [vmem:[#allocation7 + $0x8] sm:$0xff]  ;;  %v89_v4 = vld [vmem:[#allocation7 + $0x10] sm:$0xff]  ;;  %v90_v6 = vld [vmem:[#allocation7 + $0x18] sm:$0xff]  ;;  %vm92_vm1 = vcmask 261120   ;;  %s651_s21 = smov 32   ;;  %vm284_vm2 = vcmask 253952  }
  0x4d   :  { %465 = vmatprep.subr.bf16.mxu1 %v647_v0  ;;  %445 = vmatprep.mubr.msk.f32.mxu1 %vm648_vm0, %v649_v1  ;;  %v460_v5 = vpack.c.bf16 %v88_v3, %v87_v2  ;;  %v167_v7 = vld [vmem:[#allocation9] sm:$0xff]  ;;  %v168_v8 = vld [vmem:[#allocation9 + $0x8] sm:$0xff]  ;;  %v169_v9 = vld [vmem:[#allocation9 + $0x10] sm:$0xff]  ;;  %v463_v11 = vpack.c.bf16 %v90_v6, %v89_v4  ;;  %v278_v37 = vshrl.u32 %v277_v36, 7 }
  0x4e   :  { %v170_v10 = vld [vmem:[#allocation9 + $0x18] sm:$0xff]  ;;  %v466_v12 = vpack.c.bf16 %v168_v8, %v167_v7  ;;  %v297_v41 = vld [vmem:[#allocation10] sm:$0xff]  ;;  %v298_v42 = vld [vmem:[#allocation10 + $0x8] sm:$0xff] }
  0x4f   :  { %461 = vmatpush3.bf16.msra.mxu0 %v460_v5  ;;  %v469_v13 = vpack.c.bf16 %v170_v10, %v169_v9  ;;  %v86_v14 = vld [vmem:[#allocation4] sm:$0x1]  ;;  %v171_v15 = vld [vmem:[%s814_s1] sm:$0x1]  ;;  %s650_s1 = smov 64   ;;  %v279_v38 = vsub.s32 0, %v278_v37  ;;  %v472_v43 = vpack.c.bf16 %v298_v42, %v297_v41 }
  0x50   :  { %462 = vmatprep.subr.bf16.mxu0 %v647_v0  ;;  %467 = vmatpush3.bf16.msra.mxu1 %v466_v12  ;;  %v91_v16 = vld [vmem:[%s818_s5] sm:$0x1]  ;;  %v299_v44 = vld [vmem:[#allocation10 + $0x10] sm:$0xff]  ;;  %s653_s5 = smov [#allocation13]  }
  0x51   :  { %468 = vmatprep.subr.bf16.mxu1 %v647_v0  ;;  %v172_v25 = vld [vmem:[%s815_s2] sm:$0x1]  ;;  %s652_s2 = smov 96   ;;  %s392_s22 = sshll.u32 %s653_s5, 4  ;;  %s393_s22 = int_to_ptr.vmem [resolvable:$true] %s392_s22 }
  0x52   :  { %v300_v45 = vld [vmem:[#allocation10 + $0x18] sm:$0xff]  ;;  %s587_s23 = scalar_lea.vmem %s393_s22, 32  ;;  %p592_p5 = scmp.lt.s32.totalorder %s393_s22, %s393_s22 }
  0x53   :  { %464 = vmatpush3.bf16.msra.mxu0 %v463_v11  ;;  %v475_v46 = vpack.c.bf16 %v300_v45, %v299_v44  ;;  %p588_p4 = scmp.ne.s32.totalorder %s393_s22, %s587_s23  ;;  %p593_p6 = scmp.lt.s32.totalorder %s587_s23, %s587_s23 }
  0x54   :  { %471 = vmatprep.subr.bf16.mxu0 %v647_v0  ;;  %470 = vmatpush3.bf16.msra.mxu1 %v469_v13 }
  0x55   :  { %p594_p7 = por %p593_p6, %p592_p5 }
  0x56   :  { %435 = vmatmul.mubr.msk.f32.vlgmr.msra.gmra.mrb[0].mxu0 %vm92_vm1, %v86_v14 }
  0x57   :  { %456 = vmatprep.mubr.msk.f32.mxu0 %vm648_vm0, %v649_v1  ;;  %446 = vmatmul.mubr.msk.f32.vlgmr.msra.gmra.mrb[0].mxu1 %vm92_vm1, %v171_v15  ;;  %p595_p8 = pnand %p594_p7, %p588_p4 }
  0x58   :  { %473 = vmatpush3.bf16.msra.mxu0 %v472_v43 }
  0x59   :  { %474 = vmatprep.subr.bf16.mxu0 %v647_v0 }
  0x5c   :  { %476 = vmatpush3.bf16.msra.mxu0 %v475_v46 }
 0x129   :  { %v162_v17 = vpop.f32.mrb[0].mxu0 }
 0x12a   :  { %v163_v18 = vadd.f32 %v162_v17, %v91_v16  ;;  %v436_v19 = vpop.f32.mrb[1].mxu0  ;;  %v243_v20 = vpop.f32.mrb[0].mxu1 }
 0x12b   :  { %v447_v21 = vpop.f32.mrb[1].mxu1 }
 0x12c   :  { %166 = vst [vmem:[#allocation2] sm:$0x1] %v163_v18 }
 0x133   :  { %v173_v22 = vld [vmem:[#allocation2] sm:$0x1] }
 0x134   :  { %v247_v23 = vadd.f32 %v243_v20, %v173_v22 }
 0x136   :  { %491 = vtanh.f32 %v247_v23  ;;  %v409_v26 = vmul.f32 -1.442695, %v247_v23 }
 0x138   :  { %493 = vpow2.f32 %v409_v26 }
 0x140   :  { %v492_v24 = vpop.eup %491 }
 0x141   :  { %261 = vrot.lane.b32.xlu0 %v492_v24, %s650_s1 }
 0x142   :  { %v494_v27 = vpop.eup %493 }
 0x143   :  { %v251_v28 = vadd.f32 1.0, %v494_v27 }
 0x145   :  { %256 = vrot.lane.b32.xlu0 %v172_v25, %s651_s21  ;;  %495 = vrcp.f32 %v251_v28 }
 0x14f   :  { %v496_v29 = vpop.eup %495 }
 0x1b3   :  { %v262_v30 = vpop.permute.xlu0 %261 }
 0x1b4   :  { %v264_v31 = vmul.f32 %v496_v29, %v262_v30 }
 0x1b6   :  { %266 = vrot.lane.b32.xlu1 %v264_v31, %s651_s21 }
 0x1b7   :  { %v257_v32 = vpop.permute.xlu0 %256 }
 0x1b8   :  { %v259_v33 = vmul.f32 %v496_v29, %v257_v32 }
 0x228   :  { %v267_v34 = vpop.permute.xlu1 %266 }
 0x229   :  { %v269_v35 = vadd.f32 %v267_v34, %v259_v33 }
 0x22b   :  { %497 = vtanh.f32 %v269_v35  ;;  %v291_v40 = vrot.slane %v269_v35, %v279_v38 }
 0x235   :  { %v498_v39 = vpop.eup %497 }
 0x236   :  { %272 = vrot.lane.b32.xlu1 %v498_v39, %s650_s1 }
 0x23a   :  { %292 = vrot.lane.b32.xlu1 %v291_v40, %s652_s2 }
 0x2a8   :  { %v273_v47 = vpop.permute.xlu1 %272 }
 0x2a9   :  { %v275_v48 = vmul.f32 %v496_v29, %v273_v47 }
 0x2ab   :  { %v280_v49 = vrot.slane %v275_v48, %v279_v38 }
 0x2ac   :  { %v293_v50 = vpop.permute.xlu1 %292 }
 0x2ad   :  { %295 = vst.msk [vmem:[#allocation13 + $0x1] sm:$0x1] %vm284_vm2, %v293_v50  ;;  %281 = vrot.lane.b32.xlu0 %v280_v49, %s651_s21 }
 0x31f   :  { %v282_v51 = vpop.permute.xlu0 %281 }
 0x320   :  { %285 = vst.msk [vmem:[#allocation3] sm:$0x1] %vm284_vm2, %v282_v51  ;;  %286 = vst.msk [vmem:[#allocation13] sm:$0x1] %vm284_vm2, %v282_v51 }
 0x327   :  { %v296_v52 = vld [vmem:[#allocation3] sm:$0x1] }
 0x328   :  { %457 = vmatmul.mubr.msk.f32.vlgmr.msra.gmra.mrb[2].mxu0 %vm92_vm1, %v296_v52 }
 0x329   :  { %598 = shalt.err (!%p595_p8)
}
 0x32a   :  { %s599_s0 = scalar_lea.hbm %s822_s9, 32 }
 0x32b   :  { %p600_p9 = scmp.ne.s32.totalorder %s822_s9, %s599_s0  ;;  %p603_p10 = scmp.lt.u32.totalorder %s599_s0, %s822_s9 }
 0x32d   :  { %p605_p11 = pnand %p603_p10, %p600_p9 }
 0x32f   :  { %608 = shalt.err (!%p605_p11)
}
 0x330   :  { %395 = dma.vmem_to_hbm [thread:$0]  %s393_s22, 32, %s822_s9, [#allocation14]   ;;  %v301_v53 = vld [vmem:[%s820_s7] sm:$0x1] }
 0x331   :  { %s654_s10 = smov [#allocation12]  }
 0x332   :  { %s382_s14 = sshll.u32 %s654_s10, 4  ;;  %s383_s14 = int_to_ptr.vmem [resolvable:$true] %s382_s14 }
 0x333   :  { %s609_s15 = scalar_lea.vmem %s383_s14, 16  ;;  %s613_s4 = scalar_lea.vmem %s383_s14, 32 }
 0x334   :  { %p610_p12 = scmp.ne.s32.totalorder %s383_s14, %s609_s15  ;;  %p614_p13 = scmp.lt.s32.totalorder %s383_s14, %s383_s14 }
 0x335   :  { %p615_p0 = scmp.lt.s32.totalorder %s613_s4, %s609_s15 }
 0x337   :  { %p616_p1 = por %p615_p0, %p614_p13 }
 0x339   :  { %p617_p2 = pnand %p616_p1, %p610_p12 }
 0x3fb   :  { %v371_v54 = vpop.f32.mrb[2].mxu0 }
 0x3fc   :  { %v372_v55 = vadd.f32 %v371_v54, %v301_v53  ;;  %v458_v56 = vpop.f32.mrb[3].mxu0 }
 0x3fe   :  { %375 = vst [vmem:[#allocation12] sm:$0x1] %v372_v55 }
 0x3ff   :  { %620 = shalt.err (!%p617_p2)
}
 0x400   :  { %s621_s6 = scalar_lea.hbm %s821_s8, 16 }
 0x401   :  { %p622_p3 = scmp.ne.s32.totalorder %s821_s8, %s621_s6  ;;  %p625_p4 = scmp.lt.u32.totalorder %s621_s6, %s821_s8 }
 0x403   :  { %p627_p5 = pnand %p625_p4, %p622_p3 }
 0x405   :  { %630 = shalt.err (!%p627_p5)
}
 0x406   :  { %385 = dma.vmem_to_hbm [thread:$0]  %s383_s14, 16, %s821_s8, [#allocation6]  }
 0x407   :  { %637 = dma.done.wait [#allocation6], 16  }
 0x408   :  { %638 = vsyncadd [#allocation6], 4294967280 }
 0x409   :  { %639 = dma.done.wait [#allocation14], 32  }
 0x40a   :  { %640 = vsyncadd [#allocation14], 4294967264 }
 0x40b   :  { %402 = vsyncpa [#allocation5], 1 }
 0x40c   :  { %403 = vsyncpa [#allocation8], 1 }
 0x40d   :  { %404 = vsyncpa [#allocation11], 1 }
 0x40e   :  { %405 = vsyncpa [#allocation6], 1 }
 0x40f   :  { %406 = vsyncpa [#allocation14], 1 }

</bundles_post_ra>
